<compile_context>
chip_gen: v6e
topology: v6e:2x2x1
jax: 0.10.0
libtpu: 0.0.40
codegen_flags: <defaults>
</compile_context>

<pallas_src>
import functools

import jax
import jax.numpy as jnp
from jax.experimental import pallas as pl
from jax.experimental.pallas import tpu as pltpu


_MIB = 1024 * 1024
_MIN_GRID_STEPS = 8          # keep the parallel axis >= 8 steps when possible

_budget_cache = None


def _budgets():
    """(per-array block-byte target, scoped vmem limit), generation-aware."""
    global _budget_cache
    if _budget_cache is None:
        target, limit = 4 * _MIB, 32 * _MIB          # safe on v5e / v6e / v7x
        try:
            cap = pltpu.get_tpu_info().vmem_capacity_bytes
            if cap >= 96 * _MIB:                     # v5e / v6e: 128 MiB VMEM
                target, limit = 8 * _MIB, 56 * _MIB  # 3 streams x 2 bufs = 48 MiB
        except Exception:
            pass                                     # unknown -> conservative
        _budget_cache = (target, limit)
    return _budget_cache


# ----------------------------- helpers ----------------------------------- #

def _act(x, use_tanh_gate):
    return jnp.tanh(x) if use_tanh_gate else jax.nn.sigmoid(x)


def _row_tile(R, D, itemsize, target_bytes):
    """Rows per block: ~target_bytes per array, multiple of 8 (sublane),
    capped so the grid keeps >= _MIN_GRID_STEPS steps when R is large."""
    rows = max(8, target_bytes // max(1, D * itemsize))
    rows = (rows // 8) * 8
    if R >= _MIN_GRID_STEPS * 8:
        cap = max(8, (pl.cdiv(R, _MIN_GRID_STEPS) // 8) * 8)
        rows = min(rows, cap)
    if rows >= R or R <= 8:
        return R
    return rows


def _batch_tile(B, S, D, itemsize, target_bytes):
    """Batches per block, or None when even a (1, S, D) block exceeds the
    per-array budget (-> two-phase fallback instead of VMEM blow-up)."""
    per_batch = S * D * itemsize
    if per_batch > target_bytes:
        return None
    tb = max(1, target_bytes // per_batch)
    if B >= _MIN_GRID_STEPS:
        tb = min(tb, pl.cdiv(B, _MIN_GRID_STEPS))
    return int(min(B, tb))


def _lane_dense_view(B, S, D):
    """2-D view (rows, lanes) with a 128-multiple lane width when possible."""
    if D % 128 == 0:
        return B * S, D
    total = B * S * D
    for lane in (2048, 1024, 512, 256, 128):
        if total % lane == 0:
            return total // lane, lane
    # TODO(synk): pad embed_dim to a multiple of 128 upstream for unmasked
    # lane-dense stores; here we fall back to masked (TR, D) stores.
    return B * S, D


# ----------------------------- kernels ------------------------------------ #

def _add_row_kernel(old_ref, new_ref, out_ref):
    # use_gate=False: plain residual add on lane-dense row blocks.
    out_ref[...] = old_ref[...] + new_ref[...]


def _affine_row_kernel(a_ref, b_ref, old_ref, new_ref, out_ref):
    # out = a*new + b*old with per-row coefficients (precomputed in wrapper):
    #   tanh gate:    a = 1 + act(g), b = 1 - act(g)
    #   sigmoid gate: a = act(g),     b = 1 - act(g)
    old = old_ref[...]
    new = new_ref[...]
    a = a_ref[...].astype(old.dtype)                 # (TR, 1)
    b = b_ref[...].astype(old.dtype)
    out_ref[...] = (a * new + b * old).astype(out_ref.dtype)


def _dynamic_row_kernel(g_ref, old_ref, new_ref, out_ref, *, use_tanh_gate):
    # dynamic gate, per_slot_gate=True: per-row mean over the feature axis.
    old = old_ref[...]                               # (TR, D)
    new = new_ref[...]
    resid = new + old
    diff = new - old
    mean_r = jnp.mean(resid.astype(jnp.float32), axis=-1, keepdims=True)
    lg = _act(g_ref[...] * mean_r, use_tanh_gate).astype(old.dtype)
    out = resid + lg * diff if use_tanh_gate else old + lg * diff
    out_ref[...] = out.astype(out_ref.dtype)


def _rowmean_kernel(old_ref, new_ref, mean_ref):
    # two-phase coupled path, phase 1: per-(b, s) mean of (new + old) over D.
    resid = old_ref[...].astype(jnp.float32) + new_ref[...].astype(jnp.float32)
    mean_ref[...] = jnp.mean(resid, axis=-1, keepdims=True)


def _dynamic_batch_kernel(g_ref, old_ref, new_ref, out_ref, *, use_tanh_gate):
    # dynamic gate, per_slot_gate=False: per-batch mean over (slots, features).
    old = old_ref[...]                               # (TB, S, D)
    new = new_ref[...]
    resid = new + old
    diff = new - old
    resid_f32 = resid.astype(jnp.float32)
    # mean-of-means over equal counts == joint mean over dims (1, 2)
    mean_r = jnp.mean(jnp.mean(resid_f32, axis=-1, keepdims=True),
                      axis=-2, keepdims=True)        # (TB, 1, 1)
    g = g_ref[0, 0]                                  # f32 scalar from SMEM
    lg = _act(g * mean_r, use_tanh_gate).astype(old.dtype)
    out = resid + lg * diff if use_tanh_gate else old + lg * diff
    out_ref[...] = out.astype(out_ref.dtype)


def _linear_batch_kernel(w_ref, b_ref, old_ref, new_ref, out_ref, *, use_tanh_gate):
    # linear gate: gate_in = Linear(S -> S_out)(mean over features), per batch.
    old = old_ref[...]                               # (TB, S, D)
    new = new_ref[...]
    resid = new + old
    diff = new - old
    mean_r = jnp.mean(resid.astype(jnp.float32), axis=-1)        # (TB, S)
    gate_in = jnp.dot(mean_r, w_ref[...],
                      preferred_element_type=jnp.float32)        # (TB, S_out)
    gate_in = gate_in + b_ref[...]
    lg = _act(gate_in, use_tanh_gate)[:, :, None].astype(old.dtype)
    out = resid + lg * diff if use_tanh_gate else old + lg * diff
    out_ref[...] = out.astype(out_ref.dtype)


# ----------------------- two-phase coupled fallback ------------------------ #

def _two_phase_coupled(old, new, *, gate_type, per_slot_gate, use_tanh_gate,
                       params, cp, target_bytes):
    """Used when a single (1, S, D) batch block would not fit the VMEM budget:
    phase 1 row-tiled reduction -> tiny XLA gate math -> phase 2 row-tiled
    affine apply.  Stays near the HBM roofline for any S*D."""
    B, S, D = old.shape
    dtype = old.dtype
    itemsize = jnp.dtype(dtype).itemsize
    R = B * S
    old2 = old.reshape(R, D)
    new2 = new.reshape(R, D)
    TR = _row_tile(R, D, itemsize, target_bytes)
    grid = (pl.cdiv(R, TR),)
    x_spec = pl.BlockSpec((TR, D), lambda i: (i, 0))
    v_spec = pl.BlockSpec((TR, 1), lambda i: (i, 0))

    # phase 1: per-(b, s) mean of (new + old)
    means = pl.pallas_call(
        _rowmean_kernel,
        out_shape=jax.ShapeDtypeStruct((R, 1), jnp.float32),
        grid=grid, in_specs=[x_spec, x_spec], out_specs=v_spec,
        compiler_params=cp)(old2, new2).reshape(B, S)

    # tiny O(B*S) gate math in plain XLA (parameter-sized work)
    if gate_type == "linear":
        gate_in = means @ params["weight"].astype(jnp.float32) \
            + params["bias"].astype(jnp.float32)[0]              # (B, S_out)
        lg = _act(gate_in, use_tanh_gate)
        if lg.shape[1] == 1:
            lg = jnp.broadcast_to(lg, (B, S))
    else:  # dynamic, per_slot_gate=False: joint mean over (S, D) per batch
        bmean = jnp.mean(means, axis=1, keepdims=True)           # (B, 1)
        g = params["gate"].reshape(1, 1).astype(jnp.float32)
        lg = jnp.broadcast_to(_act(g * bmean, use_tanh_gate), (B, S))
    a = (1.0 + lg) if use_tanh_gate else lg
    b = 1.0 - lg

    # phase 2: row-tiled affine combine out = a*new + b*old
    out2 = pl.pallas_call(
        _affine_row_kernel,
        out_shape=jax.ShapeDtypeStruct((R, D), dtype),
        grid=grid, in_specs=[v_spec, v_spec, x_spec, x_spec], out_specs=x_spec,
        compiler_params=cp)(a.reshape(R, 1), b.reshape(R, 1), old2, new2)
    return out2.reshape(B, S, D)


# ----------------------------- wrapper ------------------------------------ #

def residual_gate_forward(old, new, *, use_gate=False, gate_type="static",
                          per_slot_gate=True, use_tanh_gate=True, params=None,
                          _force_two_phase=False):
    """Pallas implementation of ResidualGate.forward(old_value, new_value)."""
    B, S, D = old.shape
    dtype = old.dtype
    itemsize = jnp.dtype(dtype).itemsize
    target_bytes, vmem_limit = _budgets()
    cp = pltpu.CompilerParams(dimension_semantics=("parallel",),
                              vmem_limit_bytes=vmem_limit)

    # Paths that couple rows within a batch need batch-aligned blocks.
    coupled = use_gate and (gate_type == "linear" or
                            (gate_type == "dynamic" and not per_slot_gate))

    if not coupled:
        if not use_gate:
            # lane-dense 2-D view (unmasked stores even when D % 128 != 0)
            R2, L2 = _lane_dense_view(B, S, D)
            old2 = old.reshape(R2, L2)
            new2 = new.reshape(R2, L2)
            TR = _row_tile(R2, L2, itemsize, target_bytes)
            grid = (pl.cdiv(R2, TR),)
            x_spec = pl.BlockSpec((TR, L2), lambda i: (i, 0))
            out2 = pl.pallas_call(
                _add_row_kernel,
                out_shape=jax.ShapeDtypeStruct((R2, L2), dtype),
                grid=grid, in_specs=[x_spec, x_spec], out_specs=x_spec,
                compiler_params=cp)(old2, new2)
            return out2.reshape(B, S, D)

        # Flattened row view: rows are (b, s) pairs; per-row mean-over-D
        # semantics are preserved under this reshape.
        R = B * S
        old2 = old.reshape(R, D)
        new2 = new.reshape(R, D)
        TR = _row_tile(R, D, itemsize, target_bytes)
        grid = (pl.cdiv(R, TR),)
        x_spec = pl.BlockSpec((TR, D), lambda i: (i, 0))
        g_spec = pl.BlockSpec((TR, 1), lambda i: (i, 0))
        out_shape = jax.ShapeDtypeStruct((R, D), dtype)
        # TODO(synk): when D % 128 != 0 the gated-row output store is
        # lane-masked; pad embed_dim to a 128 multiple upstream if this path
        # becomes hot at narrow D.

        if gate_type == "static":
            # Data-independent gate: precompute tiny per-row coefficients.
            lg = _act(params["gate"].astype(jnp.float32).reshape(1, -1, 1),
                      use_tanh_gate)
            a = (1.0 + lg) if use_tanh_gate else lg
            b = 1.0 - lg
            a_rows = jnp.broadcast_to(a, (B, S, 1)).reshape(R, 1)
            b_rows = jnp.broadcast_to(b, (B, S, 1)).reshape(R, 1)
            out2 = pl.pallas_call(
                _affine_row_kernel, out_shape=out_shape, grid=grid,
                in_specs=[g_spec, g_spec, x_spec, x_spec], out_specs=x_spec,
                compiler_params=cp)(a_rows, b_rows, old2, new2)
            return out2.reshape(B, S, D)

        # dynamic, per_slot_gate=True (gate value expanded per flattened row;
        # mean + activation stay inside the kernel)
        g = params["gate"].astype(jnp.float32).reshape(1, -1, 1)
        g_rows = jnp.broadcast_to(g, (B, S, 1)).reshape(R, 1)
        kern = functools.partial(_dynamic_row_kernel, use_tanh_gate=use_tanh_gate)
        out2 = pl.pallas_call(
            kern, out_shape=out_shape, grid=grid,
            in_specs=[g_spec, x_spec, x_spec], out_specs=x_spec,
            compiler_params=cp)(g_rows, old2, new2)
        return out2.reshape(B, S, D)

    # ---- per-batch coupled paths -------------------------------------- #
    TB = None if _force_two_phase else _batch_tile(B, S, D, itemsize, target_bytes)
    if TB is None:
        # (1, S, D) block would blow the VMEM budget -> two-phase scheme.
        return _two_phase_coupled(old, new, gate_type=gate_type,
                                  per_slot_gate=per_slot_gate,
                                  use_tanh_gate=use_tanh_gate, params=params,
                                  cp=cp, target_bytes=target_bytes)

    grid = (pl.cdiv(B, TB),)
    x_spec = pl.BlockSpec((TB, S, D), lambda i: (i, 0, 0))
    out_shape = jax.ShapeDtypeStruct((B, S, D), dtype)

    if gate_type == "linear":
        w = params["weight"].astype(jnp.float32)     # (S, S_out), pre-transposed
        b = params["bias"].astype(jnp.float32)       # (1, S_out)
        w_spec = pl.BlockSpec(w.shape, lambda i: (0, 0))    # VMEM-resident
        b_spec = pl.BlockSpec(b.shape, lambda i: (0, 0))
        kern = functools.partial(_linear_batch_kernel, use_tanh_gate=use_tanh_gate)
        return pl.pallas_call(
            kern, out_shape=out_shape, grid=grid,
            in_specs=[w_spec, b_spec, x_spec, x_spec], out_specs=x_spec,
            compiler_params=cp)(w, b, old, new)

    # dynamic, per_slot_gate=False: scalar gate rides in SMEM (no VMEM DMA)
    g = params["gate"].reshape(1, 1).astype(jnp.float32)
    g_spec = pl.BlockSpec(memory_space=pltpu.MemorySpace.SMEM)
    kern = functools.partial(_dynamic_batch_kernel, use_tanh_gate=use_tanh_gate)
    return pl.pallas_call(
        kern, out_shape=out_shape, grid=grid,
        in_specs=[g_spec, x_spec, x_spec], out_specs=x_spec,
        compiler_params=cp)(g, old, new)


# ----------------------- pure-JAX reference (checks) ---------------------- #

def residual_gate_ref(old, new, *, use_gate, gate_type, per_slot_gate,
                      use_tanh_gate, params):
    act = jnp.tanh if use_tanh_gate else jax.nn.sigmoid
    if not use_gate:
        return new + old
    if gate_type == "static":
        lg = act(params["gate"])                                  # (S,1)/(1,1)
    elif gate_type == "linear":
        mean_residual = jnp.mean(new + old, axis=-1)              # (B, S)
        gate_in = mean_residual @ params["weight"] + params["bias"][0]
        lg = act(gate_in[..., None])                              # (B, S_out, 1)
    else:
        if per_slot_gate:
            mean_r = jnp.mean(new + old, axis=-1, keepdims=True)
        else:
            mean_r = jnp.mean(new + old, axis=(1, 2), keepdims=True)
        lg = act(params["gate"] * mean_r)
    if use_tanh_gate:
        return (1.0 + lg) * new + (1.0 - lg) * old
    return lg * new + (1.0 - lg) * old


# --------------------------------- main ------------------------------------ #

if __name__ == "__main__":
    key = jax.random.PRNGKey(0)
    kw, kb = jax.random.split(jax.random.fold_in(key, 123), 2)
    init_gate = 0.1

    def make_params(cfg, S):
        if not cfg["use_gate"]:
            return {}
        if cfg["gate_type"] == "linear":
            s_out = S if cfg["per_slot_gate"] else 1
            # nn.Linear(stm_size, s_out): weight (s_out, S) stored
            # pre-transposed as (S, s_out) for the in-kernel matmul.
            w = jax.random.normal(kw, (S, s_out), jnp.float32) * 0.1
            b = jax.random.normal(kb, (1, s_out), jnp.float32) * 0.1
            return {"weight": w, "bias": b}
        # nn.Parameter(torch.full(gate_shape, init_gate)); scalar gate kept 2-D.
        gshape = (S, 1) if cfg["per_slot_gate"] else (1, 1)
        return {"gate": jnp.full(gshape, init_gate, jnp.float32)}

    configs = [
        dict(use_gate=False, gate_type="static",  per_slot_gate=True,  use_tanh_gate=True),
        dict(use_gate=True,  gate_type="static",  per_slot_gate=True,  use_tanh_gate=True),
        dict(use_gate=True,  gate_type="static",  per_slot_gate=False, use_tanh_gate=False),
        dict(use_gate=True,  gate_type="dynamic", per_slot_gate=True,  use_tanh_gate=True),
        dict(use_gate=True,  gate_type="dynamic", per_slot_gate=False, use_tanh_gate=False),
        dict(use_gate=True,  gate_type="linear",  per_slot_gate=True,  use_tanh_gate=True),
        dict(use_gate=True,  gate_type="linear",  per_slot_gate=False, use_tanh_gate=True),
    ]

    def check(B, S, D, dtype, cfgs, atol, rtol):
        ka, kb2 = jax.random.split(jax.random.fold_in(key, B * 1000 + S * 10 + D), 2)
        old_value = jax.random.normal(ka, (B, S, D), jnp.float32).astype(dtype)
        new_value = jax.random.normal(kb2, (B, S, D), jnp.float32).astype(dtype)
        for cfg in cfgs:
            params = make_params(cfg, S)
            out = jax.block_until_ready(
                residual_gate_forward(old_value, new_value, params=params, **cfg))
            ref = residual_gate_ref(old_value.astype(jnp.float32),
                                    new_value.astype(jnp.float32),
                                    params=params, **cfg)
            assert out.shape == ref.shape and out.dtype == dtype, cfg
            assert jnp.allclose(out.astype(jnp.float32), ref, atol=atol, rtol=rtol), cfg
            coupled = cfg["use_gate"] and (
                cfg["gate_type"] == "linear"
                or (cfg["gate_type"] == "dynamic" and not cfg["per_slot_gate"]))
            if coupled:
                # also exercise the large-S*D two-phase fallback path
                out2 = jax.block_until_ready(
                    residual_gate_forward(old_value, new_value, params=params,
                                          _force_two_phase=True, **cfg))
                assert jnp.allclose(out2.astype(jnp.float32), ref,
                                    atol=atol, rtol=rtol), ("two_phase", cfg)

    # small module-consistent shape (batch, stm_size, embed_dim)
    check(2, 8, 32, jnp.float32, configs, atol=1e-5, rtol=1e-5)
    # 128-aligned embed dim -> fully lane-dense stores on every path
    check(4, 16, 128, jnp.float32, configs, atol=1e-5, rtol=1e-5)
    # bf16 smoke test: elementwise combine stays bf16, gate math in f32
    check(2, 8, 32, jnp.bfloat16,
          [dict(use_gate=True, gate_type="dynamic",
                per_slot_gate=True, use_tanh_gate=True)],
          atol=1e-1, rtol=5e-2)

    print("KERNEL_OK")
</pallas_src>

<mosaic_0001>
module attributes {stable_mosaic.version = 11 : i64} {
  func.func @_add_row_kernel(%arg0: i32, %arg1: memref<1x512xf32, #tpu.memory_space<vmem>>, %arg2: memref<1x512xf32, #tpu.memory_space<vmem>>, %arg3: memref<1x512xf32, #tpu.memory_space<vmem>>) attributes {dimension_semantics = [#tpu.dimension_semantics<parallel>], iteration_bounds = array<i64: 1>, scalar_prefetch = 0 : i64, scratch_operands = 0 : i64, tpu.core_type = #tpu.core_type<tc>, window_params = [{transform_indices = @transform_0, window_bounds = array<i64: 1, 512>}, {transform_indices = @transform_1, window_bounds = array<i64: 1, 512>}, {transform_indices = @transform_2, window_bounds = array<i64: 1, 512>}]} {
    %c0 = arith.constant 0 : index
    %c0_0 = arith.constant 0 : index
    %0 = vector.load %arg1[%c0, %c0_0] : memref<1x512xf32, #tpu.memory_space<vmem>>, vector<1x512xf32>
    %c0_1 = arith.constant 0 : index
    %c0_2 = arith.constant 0 : index
    %1 = vector.load %arg2[%c0_1, %c0_2] : memref<1x512xf32, #tpu.memory_space<vmem>>, vector<1x512xf32>
    %2 = arith.addf %0, %1 : vector<1x512xf32>
    %c0_3 = arith.constant 0 : index
    %c0_4 = arith.constant 0 : index
    %3 = vector.load %arg3[%c0_3, %c0_4] : memref<1x512xf32, #tpu.memory_space<vmem>>, vector<1x512xf32>
    tpu.vector_store %arg3[%c0_3, %c0_4], %2 {strides = array<i32>} : memref<1x512xf32, #tpu.memory_space<vmem>>, vector<1x512xf32>,
    return
  }
  func.func @transform_0(%arg0: i32) -> (i32, i32) {
    %c0_i32 = arith.constant 0 : i32
    %c0_i32_0 = arith.constant 0 : i32
    return %arg0, %c0_i32 : i32, i32
  }
  func.func @transform_1(%arg0: i32) -> (i32, i32) {
    %c0_i32 = arith.constant 0 : i32
    %c0_i32_0 = arith.constant 0 : i32
    return %arg0, %c0_i32 : i32, i32
  }
  func.func @transform_2(%arg0: i32) -> (i32, i32) {
    %c0_i32 = arith.constant 0 : i32
    %c0_i32_0 = arith.constant 0 : i32
    return %arg0, %c0_i32 : i32, i32
  }
}

</mosaic_0001>

<bundles_post_ra>
// kernel: tpu_custom_call.1
= control target key start
LH: loop header
LB: loop body
LE: loop exit
PB: predicated region body
PF: predicated region fallthrough
CT: control target
= control target key end

     0   :  { %7 = vsyncpa [#allocation3], 0  ;;  %s156_s0 = inlined_call_operand.hbm [shape: f32[1,512], index: 0, kind: input, shape index: {}]   ;;  %s157_s1 = inlined_call_operand.hbm [shape: f32[1,512], index: 1, kind: input, shape index: {}]   ;;  %s158_s2 = inlined_call_operand.hbm [shape: f32[1,512], index: 2, kind: output, shape index: {}]  }
   0x1   :  { %8 = vsyncpa [#allocation6], 0 }
   0x2   :  { %9 = vsyncpa [#allocation4], 0  ;;  %s129_s9 = smov [#allocation2]   ;;  %s130_s11 = smov [#allocation5]  }
   0x3   :  { %s16_s10 = sshll.u32 %s129_s9, 4  ;;  %s26_s12 = sshll.u32 %s130_s11, 4  ;;  %s17_s10 = int_to_ptr.vmem [resolvable:$true] %s16_s10  ;;  %s27_s12 = int_to_ptr.vmem [resolvable:$true] %s26_s12 }
   0x4   :  { %s71_s13 = scalar_lea.vmem %s17_s10, 64  ;;  %p76_p1 = scmp.lt.s32.totalorder %s17_s10, %s17_s10 }
   0x5   :  { %p72_p0 = scmp.ne.s32.totalorder %s17_s10, %s71_s13  ;;  %p77_p2 = scmp.lt.s32.totalorder %s71_s13, %s71_s13 }
   0x7   :  { %p78_p3 = por %p77_p2, %p76_p1 }
   0x9   :  { %p79_p4 = pnand %p78_p3, %p72_p0 }
   0xb   :  { %82 = shalt.err (!%p79_p4)
}
   0xc   :  { %19 = dma.hbm_to_vmem [thread:$0]  %s156_s0, 64, %s17_s10, [#allocation3]  }
   0xd   :  { %s91_s16 = scalar_lea.vmem %s27_s12, 64  ;;  %p96_p6 = scmp.lt.s32.totalorder %s27_s12, %s27_s12 }
   0xe   :  { %p92_p5 = scmp.ne.s32.totalorder %s27_s12, %s91_s16  ;;  %p97_p7 = scmp.lt.s32.totalorder %s91_s16, %s91_s16 }
  0x10   :  { %p98_p8 = por %p97_p7, %p96_p6 }
  0x12   :  { %p99_p9 = pnand %p98_p8, %p92_p5 }
  0x14   :  { %102 = shalt.err (!%p99_p9)
}
  0x15   :  { %29 = dma.hbm_to_vmem [thread:$0]  %s157_s1, 64, %s27_s12, [#allocation6]  }
  0x16   :  { %123 = dma.done.wait [#allocation3], 64  }
  0x17   :  { %124 = vsyncadd [#allocation3], 4294967232 }
  0x18   :  { %125 = dma.done.wait [#allocation6], 64  }
  0x19   :  { %126 = vsyncadd [#allocation6], 4294967232  ;;  %v39_v0 = vlaneseq  ;;  %s131_s19 = smov [#allocation7]   ;;  %v36_v1 = vld [vmem:[#allocation2] sm:$0xf] }
  0x1a   :  { %s50_s20 = sshll.u32 %s131_s19, 4  ;;  %v37_v2 = vld [vmem:[#allocation5] sm:$0xf]  ;;  %s51_s20 = int_to_ptr.vmem [resolvable:$true] %s50_s20 }
  0x1b   :  { %vm41_vm0 = vcmp.lt.s32.totalorder %v39_v0, 512  ;;  %v38_v3 = vadd.f32 %v37_v2, %v36_v1  ;;  %s103_s0 = scalar_lea.vmem %s51_s20, 64  ;;  %p108_p11 = scmp.lt.s32.totalorder %s51_s20, %s51_s20 }
  0x1c   :  { %p104_p10 = scmp.ne.s32.totalorder %s51_s20, %s103_s0  ;;  %p109_p12 = scmp.lt.s32.totalorder %s103_s0, %s103_s0 }
  0x1d   :  { %43 = vst.msk [vmem:[#allocation7] sm:$0xf] %vm41_vm0, %v38_v3 }
  0x1e   :  { %p110_p13 = por %p109_p12, %p108_p11 }
  0x20   :  { %p111_p0 = pnand %p110_p13, %p104_p10 }
  0x22   :  { %114 = shalt.err (!%p111_p0)
}
  0x23   :  { %53 = dma.vmem_to_hbm [thread:$0]  %s51_s20, 64, %s158_s2, [#allocation4]  }
  0x24   :  { %127 = dma.done.wait [#allocation4], 64  }
  0x25   :  { %128 = vsyncadd [#allocation4], 4294967232 }
  0x26   :  { %57 = vsyncpa [#allocation3], 1 }
  0x27   :  { %58 = vsyncpa [#allocation6], 1 }
  0x28   :  { %59 = vsyncpa [#allocation4], 1 }

</bundles_post_ra>
